<compile_context>
chip_gen: v5e
topology: v5e:2x2
jax: 0.10.0
libtpu: 0.0.40
codegen_flags: <defaults>
</compile_context>

<pallas_src>
import jax
import jax.numpy as jnp
from jax.experimental import pallas as pl
from jax.experimental.pallas import tpu as pltpu


def _make_weighted_sum_kernel(n_inputs):
    """Kernel: (w_ref[SMEM], x0_ref, ..., x{N-1}_ref, o_ref) -> o = sum_i w[i]*x_i."""

    def kernel(w_ref, *refs):
        x_refs = refs[:n_inputs]
        o_ref = refs[n_inputs]
        # In-register reduction over the N inputs, accumulated in f32.
        acc = x_refs[0][...].astype(jnp.float32) * w_ref[0]
        for i in range(1, n_inputs):
            acc = acc + x_refs[i][...].astype(jnp.float32) * w_ref[i]
        o_ref[...] = acc.astype(o_ref.dtype)

    return kernel


def _choose_2d_layout(total, last_dim):
    """Pick a lane-dense (rows, width) factorization of `total` elements."""
    for w in (1024, 512, 256, 128):
        if total % w == 0:
            return total // w, w
    # Fallback: keep the original last dim (may be lane-sparse).
    return total // last_dim, last_dim


# Conservative VMEM sizing so the same tiling works on v5e/v6e (128 MiB) and
# v7x (64 MiB physical): double-buffered tiles for (N inputs + 1 output) must
# fit in ~24 MiB, with the scoped limit raised to 48 MiB for headroom.
_TILE_VMEM_BUDGET = 24 * 1024 * 1024
_VMEM_LIMIT_BYTES = 48 * 1024 * 1024
_MAX_ROW_TILE = 2048


def linear_weighted_avg(inputs, weights):
    """inputs: list/tuple of identically-shaped arrays; weights: (N,) scalars."""
    n = len(inputs)
    assert n >= 1
    assert weights.shape == (n,)
    orig_shape = inputs[0].shape
    dtype = inputs[0].dtype
    weights = weights.astype(jnp.float32)

    total = 1
    for d in orig_shape:
        total *= d
    last_dim = orig_shape[-1] if len(orig_shape) > 0 else 1

    rows, width = _choose_2d_layout(total, last_dim)

    # Row-tile size from the VMEM budget: 2 buffers x (N inputs + 1 output).
    itemsize = jnp.dtype(dtype).itemsize
    bytes_per_row = width * itemsize
    tm = _TILE_VMEM_BUDGET // (2 * (n + 1) * bytes_per_row)
    tm = max(8, (tm // 8) * 8)
    tm = min(tm, _MAX_ROW_TILE)
    if rows <= tm:
        tm = rows  # full extent: exempt from the (8,128) divisibility rule

    grid = (pl.cdiv(rows, tm),)

    flat_inputs = [jnp.reshape(x, (rows, width)) for x in inputs]

    in_specs = [pl.BlockSpec(memory_space=pltpu.MemorySpace.SMEM)]  # weights
    in_specs += [pl.BlockSpec((tm, width), lambda r: (r, 0)) for _ in range(n)]
    out_spec = pl.BlockSpec((tm, width), lambda r: (r, 0))

    out = pl.pallas_call(
        _make_weighted_sum_kernel(n),
        out_shape=jax.ShapeDtypeStruct((rows, width), dtype),
        grid=grid,
        in_specs=in_specs,
        out_specs=out_spec,
        compiler_params=pltpu.CompilerParams(
            dimension_semantics=("parallel",),  # row tiles are independent
            vmem_limit_bytes=_VMEM_LIMIT_BYTES,
        ),
    )(weights, *flat_inputs)

    return jnp.reshape(out, orig_shape)


class LinearWeightedAvgPallas:
    """Mirror of the PyTorch module: n scalar weights, each init to 1/n."""

    def __init__(self, n_inputs):
        self.n_inputs = n_inputs
        self.weights = jnp.full((n_inputs,), 1.0 / n_inputs, dtype=jnp.float32)

    def __call__(self, inputs):
        return linear_weighted_avg(inputs, self.weights)


if __name__ == "__main__":
    # Small shapes: n_inputs=3 embeddings of shape (batch=2, seq=8, hidden=32).
    n_inputs = 3
    B, S, H = 2, 8, 32

    key = jax.random.PRNGKey(0)
    keys = jax.random.split(key, n_inputs)
    inputs = [jax.random.normal(k, (B, S, H), dtype=jnp.float32) for k in keys]

    module = LinearWeightedAvgPallas(n_inputs)
    out = module(inputs)
    out = jax.block_until_ready(out)

    # Reference check in plain JAX.
    ref = sum(e * w for e, w in zip(inputs, module.weights))
    assert out.shape == (B, S, H)
    assert jnp.allclose(out, ref, atol=1e-6), "mismatch vs reference"

    print("KERNEL_OK")
</pallas_src>

<mosaic_0001>
module attributes {stable_mosaic.version = 11 : i64} {
  func.func @kernel(%arg0: i32, %arg1: memref<3xf32, #tpu.memory_space<smem>>, %arg2: memref<1x512xf32, #tpu.memory_space<vmem>>, %arg3: memref<1x512xf32, #tpu.memory_space<vmem>>, %arg4: memref<1x512xf32, #tpu.memory_space<vmem>>, %arg5: memref<1x512xf32, #tpu.memory_space<vmem>>) attributes {dimension_semantics = [#tpu.dimension_semantics<parallel>], iteration_bounds = array<i64: 1>, scalar_prefetch = 0 : i64, scratch_operands = 0 : i64, tpu.core_type = #tpu.core_type<tc>, window_params = [{transform_indices = @transform_0, window_bounds = array<i64: 3>}, {transform_indices = @transform_1, window_bounds = array<i64: 1, 512>}, {transform_indices = @transform_2, window_bounds = array<i64: 1, 512>}, {transform_indices = @transform_3, window_bounds = array<i64: 1, 512>}, {transform_indices = @transform_4, window_bounds = array<i64: 1, 512>}]} {
    %c0 = arith.constant 0 : index
    %c0_0 = arith.constant 0 : index
    %0 = vector.load %arg2[%c0, %c0_0] : memref<1x512xf32, #tpu.memory_space<vmem>>, vector<1x512xf32>
    %c0_1 = arith.constant 0 : index
    %1 = memref.load %arg1[%c0_1] : memref<3xf32, #tpu.memory_space<smem>>
    %2 = vector.broadcast %1 : f32 to vector<1x512xf32>
    %3 = arith.mulf %0, %2 : vector<1x512xf32>
    %c0_2 = arith.constant 0 : index
    %c0_3 = arith.constant 0 : index
    %4 = vector.load %arg3[%c0_2, %c0_3] : memref<1x512xf32, #tpu.memory_space<vmem>>, vector<1x512xf32>
    %c1 = arith.constant 1 : index
    %5 = memref.load %arg1[%c1] : memref<3xf32, #tpu.memory_space<smem>>
    %6 = vector.broadcast %5 : f32 to vector<1x512xf32>
    %7 = arith.mulf %4, %6 : vector<1x512xf32>
    %8 = arith.addf %3, %7 : vector<1x512xf32>
    %c0_4 = arith.constant 0 : index
    %c0_5 = arith.constant 0 : index
    %9 = vector.load %arg4[%c0_4, %c0_5] : memref<1x512xf32, #tpu.memory_space<vmem>>, vector<1x512xf32>
    %c2 = arith.constant 2 : index
    %10 = memref.load %arg1[%c2] : memref<3xf32, #tpu.memory_space<smem>>
    %11 = vector.broadcast %10 : f32 to vector<1x512xf32>
    %12 = arith.mulf %9, %11 : vector<1x512xf32>
    %13 = arith.addf %8, %12 : vector<1x512xf32>
    %c0_6 = arith.constant 0 : index
    %c0_7 = arith.constant 0 : index
    %14 = vector.load %arg5[%c0_6, %c0_7] : memref<1x512xf32, #tpu.memory_space<vmem>>, vector<1x512xf32>
    tpu.vector_store %arg5[%c0_6, %c0_7], %13 {strides = array<i32>} : memref<1x512xf32, #tpu.memory_space<vmem>>, vector<1x512xf32>,
    return
  }
  func.func @transform_0(%arg0: i32) -> i32 {
    %c0_i32 = arith.constant 0 : i32
    %c0_i32_0 = arith.constant 0 : i32
    return %c0_i32 : i32
  }
  func.func @transform_1(%arg0: i32) -> (i32, i32) {
    %c0_i32 = arith.constant 0 : i32
    %c0_i32_0 = arith.constant 0 : i32
    return %arg0, %c0_i32 : i32, i32
  }
  func.func @transform_2(%arg0: i32) -> (i32, i32) {
    %c0_i32 = arith.constant 0 : i32
    %c0_i32_0 = arith.constant 0 : i32
    return %arg0, %c0_i32 : i32, i32
  }
  func.func @transform_3(%arg0: i32) -> (i32, i32) {
    %c0_i32 = arith.constant 0 : i32
    %c0_i32_0 = arith.constant 0 : i32
    return %arg0, %c0_i32 : i32, i32
  }
  func.func @transform_4(%arg0: i32) -> (i32, i32) {
    %c0_i32 = arith.constant 0 : i32
    %c0_i32_0 = arith.constant 0 : i32
    return %arg0, %c0_i32 : i32, i32
  }
}

</mosaic_0001>

<bundles_post_ra>
// kernel: tpu_custom_call.1
= control target key start
LH: loop header
LB: loop body
LE: loop exit
PB: predicated region body
PF: predicated region fallthrough
CT: control target
= control target key end

     0   :  { %9 = vsyncpa [#allocation5], 0  ;;  %s278_s0 = inlined_call_operand.hbm [shape: f32[3], index: 0, kind: input, shape index: {}]   ;;  %s279_s1 = inlined_call_operand.hbm [shape: f32[1,512], index: 1, kind: input, shape index: {}]   ;;  %s280_s2 = inlined_call_operand.hbm [shape: f32[1,512], index: 2, kind: input, shape index: {}]   ;;  %s281_s3 = inlined_call_operand.hbm [shape: f32[1,512], index: 3, kind: input, shape index: {}]   ;;  %s282_s4 = inlined_call_operand.hbm [shape: f32[1,512], index: 4, kind: output, shape index: {}]  }
   0x1   :  { %10 = vsyncpa [#allocation3], 0 }
   0x2   :  { %11 = vsyncpa [#allocation8], 0  ;;  %s38_s17 = sshll.u32 %s280_s2, 4  ;;  %s39_s17 = int_to_ptr.hbm [resolvable:$true] %s38_s17 }
   0x3   :  { %12 = vsyncpa [#allocation4], 0  ;;  %s233_s18 = smov [#allocation7]   ;;  %s18_s22 = sshll.u32 %s278_s0, 4  ;;  %s19_s22 = int_to_ptr.hbm [resolvable:$true] %s18_s22 }
   0x4   :  { %s40_s19 = sshll.u32 %s233_s18, 4  ;;  %s234_s23 = smov [#allocation2]   ;;  %s41_s19 = int_to_ptr.vmem [resolvable:$true] %s40_s19 }
   0x5   :  { %43 = dma.hbm_to_vmem [thread:$0]  %s39_s17, 64, %s41_s19, [#allocation8]  }
   0x6   :  { %21 = dma.hbm_to_smem %s19_s22, 16, %s234_s23, [#allocation5]  }
   0x7   :  { %s27_s26 = sshll.u32 %s279_s1, 4  ;;  %s235_s27 = smov [#allocation6]   ;;  %s28_s26 = int_to_ptr.hbm [resolvable:$true] %s27_s26 }
   0x8   :  { %s29_s2 = sshll.u32 %s235_s27, 4  ;;  %s49_s30 = sshll.u32 %s281_s3, 4  ;;  %s30_s2 = int_to_ptr.vmem [resolvable:$true] %s29_s2  ;;  %s50_s30 = int_to_ptr.hbm [resolvable:$true] %s49_s30 }
   0x9   :  { %32 = dma.hbm_to_vmem [thread:$0]  %s28_s26, 64, %s30_s2, [#allocation3]  }
   0xa   :  { %s236_s5 = smov [#allocation9]  }
   0xb   :  { %s51_s0 = sshll.u32 %s236_s5, 4  ;;  %s52_s0 = int_to_ptr.vmem [resolvable:$true] %s51_s0 }
   0xc   :  { %54 = dma.hbm_to_vmem [thread:$0]  %s50_s30, 64, %s52_s0, [#allocation8]  }
   0xd   :  { %225 = dma.done.wait [#allocation5], 16  }
   0xe   :  { %226 = vsyncadd [#allocation5], 4294967280 }
   0xf   :  { %227 = dma.done.wait [#allocation3], 64  }
  0x10   :  { %228 = vsyncadd [#allocation3], 4294967232 }
  0x11   :  { %229 = dma.done.wait [#allocation8], 128  }
  0x12   :  { %230 = vsyncadd [#allocation8], 4294967168 }
  0x13   :  { %71 = sfence }
  0x14   :  { %s73_s1 = sld [smem:[#allocation2]]  ;;  %v72_v0 = vld [vmem:[#allocation6] sm:$0xf]  ;;  %v76_v1 = vld [vmem:[#allocation7] sm:$0xf]  ;;  %v86_v6 = vlaneseq  ;;  %s237_s3 = smov [#allocation10]  }
  0x15   :  { %s110_s6 = sld [smem:[#allocation2 + $0x1]]  ;;  %v81_v3 = vld [vmem:[#allocation9] sm:$0xf]  ;;  %s96_s8 = sshll.u32 %s237_s3, 4  ;;  %s97_s8 = int_to_ptr.vmem [resolvable:$true] %s96_s8 }
  0x16   :  { %s111_s7 = sld [smem:[#allocation2 + $0x2]]  ;;  %s98_s11 = sshll.u32 %s282_s4, 4  ;;  %vm88_vm0 = vcmp.lt.s32.totalorder %v86_v6, 512  ;;  %s99_s11 = int_to_ptr.hbm [resolvable:$true] %s98_s11 }
  0x1a   :  { %v74_v2 = vstv %s73_s1 }
  0x1b   :  { %v75_v4 = vmul.f32 %v74_v2, %v72_v0  ;;  %v78_v5 = vstv %s110_s6 }
  0x1c   :  { %v79_v7 = vmul.f32 %v78_v5, %v76_v1  ;;  %v83_v8 = vstv %s111_s7 }
  0x1d   :  { %v84_v9 = vmul.f32 %v83_v8, %v81_v3 }
  0x1e   :  { %v80_v10 = vadd.f32 %v79_v7, %v75_v4 }
  0x20   :  { %v85_v11 = vadd.f32 %v84_v9, %v80_v10 }
  0x22   :  { %90 = vst.msk [vmem:[#allocation10] sm:$0xf] %vm88_vm0, %v85_v11 }
  0x23   :  { %101 = dma.vmem_to_hbm [thread:$0]  %s97_s8, 64, %s99_s11, [#allocation4]  }
  0x24   :  { %231 = dma.done.wait [#allocation4], 64  }
  0x25   :  { %232 = vsyncadd [#allocation4], 4294967232 }
  0x26   :  { %106 = vsyncpa [#allocation3], 1 }
  0x27   :  { %107 = vsyncpa [#allocation8], 1 }
  0x28   :  { %108 = vsyncpa [#allocation4], 1 }
  0x29   :  { %109 = vsyncpa [#allocation5], 1 }

</bundles_post_ra>
